<compile_context>
chip_gen: v7x
topology: tpu7x:2x2x1
jax: 0.10.0
libtpu: 0.0.40
codegen_flags: <defaults>
</compile_context>

<pallas_src>
import functools

import jax
import jax.numpy as jnp
from jax.experimental import pallas as pl
from jax.experimental.pallas import tpu as pltpu


# Keep per-step (double-buffered) tiles comfortably under v7x's 64 MiB physical
# VMEM; v5e/v6e have 128 MiB physical so this budget is safe everywhere.
_VMEM_TILE_BUDGET = 48 << 20


def _vmem_estimate(tile_b, tile_d, num_classes, feat_isz, w_isz, s_isz, with_acc):
    """Rough per-step VMEM footprint (double-buffered inputs/outputs + scratch)."""
    student = 2 * tile_b * num_classes * s_isz
    feats = 2 * tile_b * tile_d * feat_isz
    w = 2 * tile_d * num_classes * w_isz
    bias = 2 * num_classes * 4
    labels = 2 * tile_b * 4
    acc = tile_b * num_classes * 4 if with_acc else 0
    out = 2 * 8 * 128 * 4
    return student + feats + w + bias + labels + acc + out


def _default_num_batch_tiles(batch):
    """1 batch tile on single-TC chips (v5e/v6e); 2 on v7x (one per TensorCore)."""
    try:
        kind = jax.devices()[0].device_kind.lower()
    except Exception:
        kind = ""
    if "v7" in kind and batch >= 16 and batch % 16 == 0:
        return 2
    return 1


def _kd_epilogue(student_ref, label_ref, t_logits, out_ref, *, temperature,
                 alpha, batch_size):
    """Shared epilogue: softmaxes, KL + CE partial loss for one batch tile."""
    s = student_ref[...].astype(jnp.float32)        # (tile_b, C)
    inv_t = 1.0 / temperature

    # Single cross-lane max, reused by both the temperature softmax and the CE
    # log-softmax (softmax(s/T) == softmax((s - s_max)/T) since T > 0).
    s_max = jnp.max(s, axis=1, keepdims=True)
    d = s - s_max

    # Student "soft probabilities": softmax(student_logits / T).
    # exp(log_softmax) form: no VPU divide, exps go to the EUP slot.
    d_t = d * inv_t
    s_lse_t = jnp.log(jnp.sum(jnp.exp(d_t), axis=1, keepdims=True))
    soft_probs = jnp.exp(d_t - s_lse_t)

    # Teacher soft targets in log-sum-exp form (no log(0) -> -inf/NaN path;
    # matches PyTorch KLDivLoss's zeroing of target==0 terms).
    t_t = t_logits * inv_t
    t_shift = t_t - jnp.max(t_t, axis=1, keepdims=True)
    t_lse = jnp.log(jnp.sum(jnp.exp(t_shift), axis=1, keepdims=True))
    log_soft_targets = t_shift - t_lse
    soft_targets = jnp.exp(log_soft_targets)

    # KLDivLoss(reduction='batchmean')(input=soft_probs, target=soft_targets).
    # NOTE: feeding probabilities (not log-probs) is intentional — it is
    # faithful to the PyTorch module. Do not "fix" only one side.
    kl_part = jnp.sum(soft_targets * (log_soft_targets - soft_probs))

    # CrossEntropyLoss(student_logits, labels): reuse d = s - s_max; one-hot is
    # built in-kernel from the (tile_b, 1) int32 labels — no (B, C) HBM one-hot.
    log_softmax = d - jnp.log(jnp.sum(jnp.exp(d), axis=1, keepdims=True))
    tile_b, num_classes = log_softmax.shape
    col_ids = jax.lax.broadcasted_iota(jnp.int32, (tile_b, num_classes), 1)
    onehot = (col_ids == label_ref[...]).astype(jnp.float32)
    ce_part = -jnp.sum(onehot * log_softmax)

    partial = (alpha * kl_part + (1.0 - alpha) * ce_part) / batch_size
    out_ref[...] = jnp.full(out_ref.shape, partial, dtype=jnp.float32)


def _kd_kernel_single_chunk(student_ref, feat_ref, w_ref, b_ref, label_ref,
                            out_ref, *, temperature, alpha, batch_size):
    """num_d == 1 fast path: no accumulator scratch / round-trip, grid=(num_b,)."""
    t_logits = (jnp.dot(feat_ref[...], w_ref[...],
                        preferred_element_type=jnp.float32)
                + b_ref[...].astype(jnp.float32))
    _kd_epilogue(student_ref, label_ref, t_logits, out_ref,
                 temperature=temperature, alpha=alpha, batch_size=batch_size)


def _kd_kernel_multi_chunk(student_ref, feat_ref, w_ref, b_ref, label_ref,
                           out_ref, acc_ref, *, temperature, alpha, batch_size):
    """grid=(num_b, num_d); D (reduction) axis innermost & 'arbitrary'."""
    k = pl.program_id(1)

    @pl.when(k == 0)
    def _init():
        # Teacher bias folded into the accumulator init — removes a (tile_b, C)
        # add from the epilogue at zero extra cost.
        acc_ref[...] = jnp.broadcast_to(b_ref[...].astype(jnp.float32),
                                        acc_ref.shape)

    # Teacher forward for this D-chunk: MXU matmul (bf16-friendly), f32 accumulate.
    acc_ref[...] += jnp.dot(feat_ref[...], w_ref[...],
                            preferred_element_type=jnp.float32)

    # out_ref is written only on the last D chunk; this is correct because the
    # output block index is constant over k, so no intermediate writeback occurs.
    @pl.when(k == pl.num_programs(1) - 1)
    def _finalize():
        _kd_epilogue(student_ref, label_ref, acc_ref[...], out_ref,
                     temperature=temperature, alpha=alpha,
                     batch_size=batch_size)


def kd_loss_pallas(student_logits, features_nchw, labels, teacher_w, teacher_b,
                   *, alpha=0.1, temperature=20.0, tile_d=1024,
                   num_batch_tiles=None, vmem_limit_bytes=None):
    """Fused traditional-KD loss on TPU via Pallas.

    features / teacher_w may be bf16 (recommended: halves HBM traffic); the
    matmul still accumulates in f32. Casts happen on VMEM tiles inside the
    kernel — no wrapper-side dtype materialization.
    """
    batch, num_classes = student_logits.shape
    feats_flat = features_nchw.reshape(batch, -1)   # NCHW row-major flatten, keeps dtype
    feat_dim = feats_flat.shape[1]

    # ---- D tiling: bounded streaming tile; ragged D is zero-padded (padding
    # both features and W with zeros leaves feats @ W unchanged).
    tile_d = min(int(tile_d), feat_dim)
    d_padded = pl.cdiv(feat_dim, tile_d) * tile_d
    if d_padded != feat_dim:
        feats_flat = jnp.pad(feats_flat, ((0, 0), (0, d_padded - feat_dim)))
        teacher_w = jnp.pad(teacher_w, ((0, d_padded - feat_dim), (0, 0)))
    num_d = d_padded // tile_d

    # ---- Batch tiling: 1 tile on single-TC chips, 2 on v7x; split further only
    # if the explicit per-step VMEM budget forces it.
    if num_batch_tiles is None:
        num_batch_tiles = _default_num_batch_tiles(batch)
    num_b = max(1, min(int(num_batch_tiles), batch))
    if batch % num_b != 0:
        num_b = 1
    tile_b = batch // num_b

    feat_isz = jnp.dtype(feats_flat.dtype).itemsize
    w_isz = jnp.dtype(teacher_w.dtype).itemsize
    s_isz = jnp.dtype(student_logits.dtype).itemsize
    while (_vmem_estimate(tile_b, tile_d, num_classes, feat_isz, w_isz, s_isz,
                          num_d > 1) > _VMEM_TILE_BUDGET
           and tile_b % 16 == 0):
        num_b *= 2
        tile_b //= 2

    if vmem_limit_bytes is None:
        est = _vmem_estimate(tile_b, tile_d, num_classes, feat_isz, w_isz, s_isz,
                             num_d > 1)
        # 2x headroom + slack, never below the 32 MiB default, capped for v7x.
        vmem_limit_bytes = int(min(max(2 * est + (4 << 20), 32 << 20), 56 << 20))

    labels_2d = labels.astype(jnp.int32).reshape(batch, 1)
    bias_2d = teacher_b.reshape(1, num_classes)

    common = dict(temperature=float(temperature), alpha=float(alpha),
                  batch_size=float(batch))

    if num_d == 1:
        # Fast path: single D chunk, no accumulator scratch, 1-D grid.
        kernel = functools.partial(_kd_kernel_single_chunk, **common)
        grid_spec = pltpu.PrefetchScalarGridSpec(
            num_scalar_prefetch=0,
            grid=(num_b,),
            in_specs=[
                pl.BlockSpec((tile_b, num_classes), lambda i: (i, 0)),  # student logits
                pl.BlockSpec((tile_b, tile_d), lambda i: (i, 0)),       # features
                pl.BlockSpec((tile_d, num_classes), lambda i: (0, 0)),  # teacher W
                pl.BlockSpec((1, num_classes), lambda i: (0, 0)),       # teacher bias
                pl.BlockSpec((tile_b, 1), lambda i: (i, 0)),            # int32 labels
            ],
            out_specs=pl.BlockSpec((1, 8, 128), lambda i: (i, 0, 0)),
            scratch_shapes=[],
        )
        dim_sem = ("parallel",)
    else:
        kernel = functools.partial(_kd_kernel_multi_chunk, **common)
        grid_spec = pltpu.PrefetchScalarGridSpec(
            num_scalar_prefetch=0,
            grid=(num_b, num_d),
            in_specs=[
                pl.BlockSpec((tile_b, num_classes), lambda i, k: (i, 0)),  # student logits
                pl.BlockSpec((tile_b, tile_d), lambda i, k: (i, k)),       # features chunk
                pl.BlockSpec((tile_d, num_classes), lambda i, k: (k, 0)),  # teacher W chunk
                pl.BlockSpec((1, num_classes), lambda i, k: (0, 0)),       # teacher bias
                pl.BlockSpec((tile_b, 1), lambda i, k: (i, 0)),            # int32 labels
            ],
            out_specs=pl.BlockSpec((1, 8, 128), lambda i, k: (i, 0, 0)),
            scratch_shapes=[pltpu.VMEM((tile_b, num_classes), jnp.float32)],
        )
        # Reduction (D) axis innermost & 'arbitrary'; batch axis 'parallel'.
        # TODO(synk): on v7x, pltpu.CORE_PARALLEL on the batch axis may shard the
        # two batch tiles across the two TensorCores; verify before enabling.
        dim_sem = ("parallel", "arbitrary")

    partials = pl.pallas_call(
        kernel,
        out_shape=jax.ShapeDtypeStruct((num_b, 8, 128), jnp.float32),
        grid_spec=grid_spec,
        compiler_params=pltpu.CompilerParams(
            dimension_semantics=dim_sem,
            vmem_limit_bytes=vmem_limit_bytes),
    )(student_logits, feats_flat, teacher_w, bias_2d, labels_2d)

    # Each batch-tile block carries its partial loss broadcast across the block.
    return jnp.sum(partials[:, 0, 0])


def kd_loss_ref(student_logits, features_nchw, labels, teacher_w, teacher_b,
                *, alpha=0.1, temperature=20.0):
    """Pure-JAX reference mirroring the PyTorch module exactly."""
    batch, num_classes = student_logits.shape
    s = student_logits.astype(jnp.float32)
    feats = features_nchw.reshape(batch, -1)
    t_logits = (jnp.dot(feats, teacher_w, preferred_element_type=jnp.float32)
                + teacher_b.astype(jnp.float32))
    soft_probs = jax.nn.softmax(s / temperature, axis=1)
    log_soft_targets = jax.nn.log_softmax(t_logits / temperature, axis=1)
    soft_targets = jnp.exp(log_soft_targets)
    kl = jnp.sum(soft_targets * (log_soft_targets - soft_probs)) / batch
    log_softmax = jax.nn.log_softmax(s, axis=1)
    ce = -jnp.mean(log_softmax[jnp.arange(batch), labels])
    return alpha * kl + (1.0 - alpha) * ce


if __name__ == "__main__":
    key = jax.random.PRNGKey(0)
    k1, k2, k3, k4, k5 = jax.random.split(key, 5)

    batch, c_in, hw, num_classes = 2, 4, 16, 10
    feat_dim = c_in * hw * hw   # 1024

    # Inputs (deterministic). Features / teacher weights in bf16 to exercise the
    # bandwidth-optimized path; student logits stay f32 as in training.
    student_logits = jax.random.normal(k1, (batch, num_classes), dtype=jnp.float32)
    features = jax.random.normal(
        k2, (batch, c_in, hw, hw), dtype=jnp.float32).astype(jnp.bfloat16)  # NCHW
    labels = jax.random.randint(k3, (batch,), 0, num_classes)

    # Deterministically initialized teacher (linear classifier on flattened NCHW).
    teacher_w = (jax.random.normal(k4, (feat_dim, num_classes), dtype=jnp.float32)
                 * 0.02).astype(jnp.bfloat16)
    teacher_b = jax.random.normal(k5, (num_classes,), dtype=jnp.float32) * 0.01

    alpha, temperature = 0.1, 20.0

    loss = kd_loss_pallas(student_logits, features, labels, teacher_w, teacher_b,
                          alpha=alpha, temperature=temperature)
    loss = jax.block_until_ready(loss)

    ref = kd_loss_ref(student_logits, features, labels, teacher_w, teacher_b,
                      alpha=alpha, temperature=temperature)
    assert jnp.allclose(loss, ref, rtol=1e-5, atol=1e-5), (loss, ref)

    print("KERNEL_OK")
</pallas_src>

<mosaic_0001>
module attributes {stable_mosaic.version = 11 : i64} {
  func.func @_kd_kernel_single_chunk(%arg0: i32, %arg1: memref<2x10xf32, #tpu.memory_space<vmem>>, %arg2: memref<2x1024xbf16, #tpu.memory_space<vmem>>, %arg3: memref<1024x10xbf16, #tpu.memory_space<vmem>>, %arg4: memref<1x10xf32, #tpu.memory_space<vmem>>, %arg5: memref<2x1xi32, #tpu.memory_space<vmem>>, %arg6: memref<1x8x128xf32, #tpu.memory_space<vmem>>) attributes {dimension_semantics = [#tpu.dimension_semantics<parallel>], iteration_bounds = array<i64: 1>, scalar_prefetch = 0 : i64, scratch_operands = 0 : i64, tpu.core_type = #tpu.core_type<tc>, window_params = [{transform_indices = @transform_0, window_bounds = array<i64: 2, 10>}, {transform_indices = @transform_1, window_bounds = array<i64: 2, 1024>}, {pipeline_mode = #tpu.pipeline_mode<synchronous>, transform_indices = @transform_2, window_bounds = array<i64: 1024, 10>}, {pipeline_mode = #tpu.pipeline_mode<synchronous>, transform_indices = @transform_3, window_bounds = array<i64: 1, 10>}, {transform_indices = @transform_4, window_bounds = array<i64: 2, 1>}, {transform_indices = @transform_5, window_bounds = array<i64: 1, 8, 128>}]} {
    %c0 = arith.constant 0 : index
    %c0_0 = arith.constant 0 : index
    %0 = vector.load %arg2[%c0, %c0_0] : memref<2x1024xbf16, #tpu.memory_space<vmem>>, vector<2x1024xbf16>
    %c0_1 = arith.constant 0 : index
    %c0_2 = arith.constant 0 : index
    %1 = vector.load %arg3[%c0_1, %c0_2] : memref<1024x10xbf16, #tpu.memory_space<vmem>>, vector<1024x10xbf16>
    %cst = arith.constant dense<0.000000e+00> : vector<2x10xf32>
    %2 = tpu.matmul %0, %1, %cst {dimension_numbers = #tpu.dot_dimension_numbers<[1], [0], [0], [1], [0, 0, 1, 1], [], []>} : vector<2x1024xbf16>, vector<1024x10xbf16>, vector<2x10xf32> -> vector<2x10xf32>
    %c0_3 = arith.constant 0 : index
    %c0_4 = arith.constant 0 : index
    %3 = vector.load %arg4[%c0_3, %c0_4] : memref<1x10xf32, #tpu.memory_space<vmem>>, vector<1x10xf32>
    %4 = vector.broadcast %3 : vector<1x10xf32> to vector<2x10xf32>
    %5 = arith.addf %2, %4 : vector<2x10xf32>
    %c0_5 = arith.constant 0 : index
    %c0_6 = arith.constant 0 : index
    %6 = vector.load %arg1[%c0_5, %c0_6] : memref<2x10xf32, #tpu.memory_space<vmem>>, vector<2x10xf32>
    %cst_7 = arith.constant dense<0xFF800000> : vector<2xf32>
    %7 = vector.multi_reduction <maximumf>, %6, %cst_7 [1] : vector<2x10xf32> to vector<2xf32>
    %8 = vector.shape_cast %7 : vector<2xf32> to vector<2x1xf32>
    %9 = vector.broadcast %8 : vector<2x1xf32> to vector<2x10xf32>
    %10 = arith.subf %6, %9 : vector<2x10xf32>
    %cst_8 = arith.constant 5.000000e-02 : f32
    %11 = vector.broadcast %cst_8 : f32 to vector<2x10xf32>
    %12 = arith.mulf %10, %11 : vector<2x10xf32>
    %13 = math.exp %12 : vector<2x10xf32>
    %cst_9 = arith.constant dense<0.000000e+00> : vector<2xf32>
    %14 = vector.multi_reduction <add>, %13, %cst_9 [1] : vector<2x10xf32> to vector<2xf32>
    %15 = vector.shape_cast %14 : vector<2xf32> to vector<2x1xf32>
    %16 = math.log %15 : vector<2x1xf32>
    %17 = vector.broadcast %16 : vector<2x1xf32> to vector<2x10xf32>
    %18 = arith.subf %12, %17 : vector<2x10xf32>
    %19 = math.exp %18 : vector<2x10xf32>
    %cst_10 = arith.constant 5.000000e-02 : f32
    %20 = vector.broadcast %cst_10 : f32 to vector<2x10xf32>
    %21 = arith.mulf %5, %20 : vector<2x10xf32>
    %cst_11 = arith.constant dense<0xFF800000> : vector<2xf32>
    %22 = vector.multi_reduction <maximumf>, %21, %cst_11 [1] : vector<2x10xf32> to vector<2xf32>
    %23 = vector.shape_cast %22 : vector<2xf32> to vector<2x1xf32>
    %24 = vector.broadcast %23 : vector<2x1xf32> to vector<2x10xf32>
    %25 = arith.subf %21, %24 : vector<2x10xf32>
    %26 = math.exp %25 : vector<2x10xf32>
    %cst_12 = arith.constant dense<0.000000e+00> : vector<2xf32>
    %27 = vector.multi_reduction <add>, %26, %cst_12 [1] : vector<2x10xf32> to vector<2xf32>
    %28 = vector.shape_cast %27 : vector<2xf32> to vector<2x1xf32>
    %29 = math.log %28 : vector<2x1xf32>
    %30 = vector.broadcast %29 : vector<2x1xf32> to vector<2x10xf32>
    %31 = arith.subf %25, %30 : vector<2x10xf32>
    %32 = math.exp %31 : vector<2x10xf32>
    %33 = arith.subf %31, %19 : vector<2x10xf32>
    %34 = arith.mulf %32, %33 : vector<2x10xf32>
    %35 = vector.shape_cast %34 : vector<2x10xf32> to vector<1x2x10xf32>
    %cst_13 = arith.constant dense<0.000000e+00> : vector<1xf32>
    %36 = vector.multi_reduction <add>, %35, %cst_13 [1, 2] : vector<1x2x10xf32> to vector<1xf32>
    %37 = vector.shape_cast %36 : vector<1xf32> to vector<1x1x1xf32>
    %38 = vector.extract %37[0, 0, 0] : f32 from vector<1x1x1xf32>
    %39 = math.exp %10 : vector<2x10xf32>
    %cst_14 = arith.constant dense<0.000000e+00> : vector<2xf32>
    %40 = vector.multi_reduction <add>, %39, %cst_14 [1] : vector<2x10xf32> to vector<2xf32>
    %41 = vector.shape_cast %40 : vector<2xf32> to vector<2x1xf32>
    %42 = math.log %41 : vector<2x1xf32>
    %43 = vector.broadcast %42 : vector<2x1xf32> to vector<2x10xf32>
    %44 = arith.subf %10, %43 : vector<2x10xf32>
    %45 = tpu.iota {dimensions = array<i32: 1>} : vector<2x10xi32>
    %c0_15 = arith.constant 0 : index
    %c0_16 = arith.constant 0 : index
    %46 = vector.load %arg5[%c0_15, %c0_16] : memref<2x1xi32, #tpu.memory_space<vmem>>, vector<2x1xi32>
    %47 = vector.broadcast %46 : vector<2x1xi32> to vector<2x10xi32>
    %48 = arith.cmpi eq, %45, %47 : vector<2x10xi32>
    %49 = arith.extui %48 : vector<2x10xi1> to vector<2x10xi32>
    %50 = arith.sitofp %49 : vector<2x10xi32> to vector<2x10xf32>
    %51 = arith.mulf %50, %44 : vector<2x10xf32>
    %52 = vector.shape_cast %51 : vector<2x10xf32> to vector<1x2x10xf32>
    %cst_17 = arith.constant dense<0.000000e+00> : vector<1xf32>
    %53 = vector.multi_reduction <add>, %52, %cst_17 [1, 2] : vector<1x2x10xf32> to vector<1xf32>
    %54 = vector.shape_cast %53 : vector<1xf32> to vector<1x1x1xf32>
    %55 = vector.extract %54[0, 0, 0] : f32 from vector<1x1x1xf32>
    %cst_18 = arith.constant 0.000000e+00 : f32
    %56 = arith.subf %cst_18, %55 : f32
    %cst_19 = arith.constant 1.000000e-01 : f32
    %57 = arith.mulf %cst_19, %38 : f32
    %cst_20 = arith.constant 0.899999976 : f32
    %58 = arith.mulf %cst_20, %56 : f32
    %59 = arith.addf %57, %58 : f32
    %cst_21 = arith.constant 2.000000e+00 : f32
    %60 = arith.divf %59, %cst_21 : f32
    %61 = vector.broadcast %60 : f32 to vector<1x8x128xf32>
    %c0_22 = arith.constant 0 : index
    %c0_23 = arith.constant 0 : index
    %c0_24 = arith.constant 0 : index
    %62 = vector.load %arg6[%c0_22, %c0_23, %c0_24] : memref<1x8x128xf32, #tpu.memory_space<vmem>>, vector<1x8x128xf32>
    tpu.vector_store %arg6[%c0_22, %c0_23, %c0_24], %61 {strides = array<i32>} : memref<1x8x128xf32, #tpu.memory_space<vmem>>, vector<1x8x128xf32>,
    return
  }
  func.func @transform_0(%arg0: i32) -> (i32, i32) {
    %c0_i32 = arith.constant 0 : i32
    %c0_i32_0 = arith.constant 0 : i32
    return %arg0, %c0_i32 : i32, i32
  }
  func.func @transform_1(%arg0: i32) -> (i32, i32) {
    %c0_i32 = arith.constant 0 : i32
    %c0_i32_0 = arith.constant 0 : i32
    return %arg0, %c0_i32 : i32, i32
  }
  func.func @transform_2(%arg0: i32) -> (i32, i32) {
    %c0_i32 = arith.constant 0 : i32
    %c0_i32_0 = arith.constant 0 : i32
    %c0_i32_1 = arith.constant 0 : i32
    return %c0_i32, %c0_i32_0 : i32, i32
  }
  func.func @transform_3(%arg0: i32) -> (i32, i32) {
    %c0_i32 = arith.constant 0 : i32
    %c0_i32_0 = arith.constant 0 : i32
    %c0_i32_1 = arith.constant 0 : i32
    return %c0_i32, %c0_i32_0 : i32, i32
  }
  func.func @transform_4(%arg0: i32) -> (i32, i32) {
    %c0_i32 = arith.constant 0 : i32
    %c0_i32_0 = arith.constant 0 : i32
    return %arg0, %c0_i32 : i32, i32
  }
  func.func @transform_5(%arg0: i32) -> (i32, i32, i32) {
    %c0_i32 = arith.constant 0 : i32
    %c0_i32_0 = arith.constant 0 : i32
    %c0_i32_1 = arith.constant 0 : i32
    return %arg0, %c0_i32, %c0_i32_0 : i32, i32, i32
  }
}

</mosaic_0001>

<bundles_post_ra>
// kernel: tpu_custom_call.1
= control target key start
LH: loop header
LB: loop body
LE: loop exit
PB: predicated region body
PF: predicated region fallthrough
CT: control target
= control target key end

     0   :  { %v163_v28 = vlaneseq  ;;  %v1124_v36 = vmov 1966171168   ;;  %vm761_vm0 = vcmask 74752   ;;  %s1401_s0 = inlined_call_operand.vmem [shape: f32[2,10], index: 0, kind: input, shape index: {}]   ;;  %s1402_s1 = inlined_call_operand.vmem [shape: bf16[2,1024], index: 1, kind: input, shape index: {}]   ;;  %s1403_s2 = inlined_call_operand.vmem [shape: bf16[1024,10], index: 2, kind: input, shape index: {}]   ;;  %s1404_s3 = inlined_call_operand.vmem [shape: f32[1,10], index: 3, kind: input, shape index: {}]   ;;  %s1405_s4 = inlined_call_operand.vmem [shape: s32[2,1], index: 4, kind: input, shape index: {}]   ;;  %s1406_s5 = inlined_call_operand.hbm [shape: f32[1,8,128], index: 5, kind: output, shape index: {}]  }
   0x1   :  { %v1019_v0 = vld [vmem:[%s1403_s2 + $0x40] sm:$0xff]   ;;  %v1023_v4 = vld [vmem:[%s1403_s2 + $0x48] sm:$0xff]   ;;  %v1027_v8 = vld [vmem:[%s1403_s2 + $0x50] sm:$0xff]   ;;  %v161_v37 = vunpack.c.l.s4 %v1124_v36 }
   0x2   :  { %v1020_v1 = vld [vmem:[%s1403_s2 + $0xc0] sm:$0xff]   ;;  %921 = vmatprep.subr.bf16.mxu0 %v1019_v0  ;;  %v1024_v5 = vld [vmem:[%s1403_s2 + $0xc8] sm:$0xff]   ;;  %v1028_v9 = vld [vmem:[%s1403_s2 + $0xd0] sm:$0xff]   ;;  %v164_v33 = vshrl.u32 %v163_v28, 7 }
   0x3   :  { %v1021_v2 = vld [vmem:[%s1403_s2] sm:$0xff]   ;;  %943 = vmatprep.subr.bf16.mxu1 %v1020_v1  ;;  %v1025_v6 = vld [vmem:[%s1403_s2 + $0x8] sm:$0xff]   ;;  %v1029_v10 = vld [vmem:[%s1403_s2 + $0x10] sm:$0xff]   ;;  %v162_v40 = vunpack.c.0.s8 %v161_v37 }
   0x4   :  { %v1022_v3 = vld [vmem:[%s1403_s2 + $0x80] sm:$0xff]   ;;  %922 = vmatpush3.bf16.msra.mxu0 %v1021_v2  ;;  %v1026_v7 = vld [vmem:[%s1403_s2 + $0x88] sm:$0xff]   ;;  %v1030_v11 = vld [vmem:[%s1403_s2 + $0x90] sm:$0xff]  }
   0x5   :  { %944 = vmatpush3.bf16.msra.mxu1 %v1022_v3  ;;  %923 = vmatprep.subr.bf16.mxu0 %v1023_v4  ;;  %v1031_v12 = vld [vmem:[%s1403_s2 + $0x58] sm:$0xff]   ;;  %v1035_v16 = vld [vmem:[%s1403_s2 + $0x60] sm:$0xff]   ;;  %v1039_v20 = vld [vmem:[%s1403_s2 + $0x68] sm:$0xff]   ;;  %v1264_v41 = vsub.s32 %v162_v40, %v164_v33 }
   0x6   :  { %945 = vmatprep.subr.bf16.mxu1 %v1024_v5  ;;  %v1032_v13 = vld [vmem:[%s1403_s2 + $0xd8] sm:$0xff]   ;;  %v1036_v17 = vld [vmem:[%s1403_s2 + $0xe0] sm:$0xff]   ;;  %v1040_v21 = vld [vmem:[%s1403_s2 + $0xe8] sm:$0xff]  }
   0x7   :  { %v1033_v14 = vld [vmem:[%s1403_s2 + $0x18] sm:$0xff]   ;;  %v1037_v18 = vld [vmem:[%s1403_s2 + $0x20] sm:$0xff]   ;;  %v1041_v22 = vld [vmem:[%s1403_s2 + $0x28] sm:$0xff]  }
   0x8   :  { %924 = vmatpush3.bf16.msra.mxu0 %v1025_v6  ;;  %v1034_v15 = vld [vmem:[%s1403_s2 + $0x98] sm:$0xff]   ;;  %v1038_v19 = vld [vmem:[%s1403_s2 + $0xa0] sm:$0xff]   ;;  %v1042_v23 = vld [vmem:[%s1403_s2 + $0xa8] sm:$0xff]  }
   0x9   :  { %946 = vmatpush3.bf16.msra.mxu1 %v1026_v7  ;;  %925 = vmatprep.subr.bf16.mxu0 %v1027_v8  ;;  %v1043_v24 = vld [vmem:[%s1403_s2 + $0x70] sm:$0xff]   ;;  %v1047_v29 = vld [vmem:[%s1403_s2 + $0x78] sm:$0xff]   ;;  %v22_v34 = vld [vmem:[%s1402_s1] sm:$0xff] }
   0xa   :  { %947 = vmatprep.subr.bf16.mxu1 %v1028_v9  ;;  %v1044_v25 = vld [vmem:[%s1403_s2 + $0xf0] sm:$0xff]   ;;  %v1048_v30 = vld [vmem:[%s1403_s2 + $0xf8] sm:$0xff]   ;;  %v1052_v35 = vld [vmem:[%s1403_s2 + $0x140] sm:$0xff]   ;;  %v159_v39 = vcombine.high %v22_v34, %v22_v34  ;;  %v166_v42 = vrot.slane %v22_v34, %v1264_v41 }
   0xb   :  { %v1045_v26 = vld [vmem:[%s1403_s2 + $0x30] sm:$0xff]   ;;  %v1049_v31 = vld [vmem:[%s1403_s2 + $0x38] sm:$0xff]   ;;  %v1053_v38 = vld [vmem:[%s1403_s2 + $0x1c0] sm:$0xff]  }
   0xc   :  { %926 = vmatpush3.bf16.msra.mxu0 %v1029_v10  ;;  %v1046_v27 = vld [vmem:[%s1403_s2 + $0xb0] sm:$0xff]   ;;  %v1050_v32 = vld [vmem:[%s1403_s2 + $0xb8] sm:$0xff]   ;;  %v1268_v43 = vrot.slane %v159_v39, %v1264_v41  ;;  %v174_v44 = vcombine.high %v166_v42, %v166_v42  ;;  %v182_v45 = vrot.slane %v166_v42, %v1264_v41  ;;  %v1054_v48 = vld [vmem:[%s1403_s2 + $0x100] sm:$0xff]  }
   0xd   :  { %948 = vmatpush3.bf16.msra.mxu1 %v1030_v11  ;;  %927 = vmatprep.subr.bf16.mxu0 %v1031_v12  ;;  %v1056_v51 = vld [vmem:[%s1403_s2 + $0x148] sm:$0xff]   ;;  %v1055_v53 = vld [vmem:[%s1403_s2 + $0x180] sm:$0xff]   ;;  %v1060_v57 = vld [vmem:[%s1403_s2 + $0x150] sm:$0xff]  }
   0xe   :  { %949 = vmatprep.subr.bf16.mxu1 %v1032_v13  ;;  %v175_v46 = vcombine.high %v1268_v43, %v1268_v43  ;;  %v196_v47 = vrot.slane %v174_v44, %v1264_v41  ;;  %v204_v50 = vcombine.high %v182_v45, %v182_v45  ;;  %v1057_v54 = vld [vmem:[%s1403_s2 + $0x1c8] sm:$0xff]   ;;  %v1061_v59 = vld [vmem:[%s1403_s2 + $0x1d0] sm:$0xff]   ;;  %v1064_v61 = vld [vmem:[%s1403_s2 + $0x158] sm:$0xff]  }
   0xf   :  { %v1058_v56 = vld [vmem:[%s1403_s2 + $0x108] sm:$0xff]   ;;  %v1062_v60 = vld [vmem:[%s1403_s2 + $0x110] sm:$0xff]   ;;  %v1065_v63 = vld [vmem:[%s1403_s2 + $0x1d8] sm:$0xff]  }
  0x10   :  { %928 = vmatpush3.bf16.msra.mxu0 %v1033_v14  ;;  %v203_v49 = vrot.slane %v175_v46, %v1264_v41  ;;  %632 = vmatprep.mubr.bf16.mxu0 %v196_v47  ;;  %v206_v52 = vcombine.high %v196_v47, %v196_v47  ;;  %v1059_v58 = vld [vmem:[%s1403_s2 + $0x188] sm:$0xff]   ;;  %v1063_v62 = vld [vmem:[%s1403_s2 + $0x190] sm:$0xff]   ;;  %v1066_v0 = vld [vmem:[%s1403_s2 + $0x118] sm:$0xff]  }
  0x11   :  { %950 = vmatpush3.bf16.msra.mxu1 %v1034_v15  ;;  %929 = vmatprep.subr.bf16.mxu0 %v1035_v16  ;;  %v1068_v1 = vld [vmem:[%s1403_s2 + $0x160] sm:$0xff]   ;;  %v1067_v2 = vld [vmem:[%s1403_s2 + $0x198] sm:$0xff]   ;;  %v1072_v5 = vld [vmem:[%s1403_s2 + $0x168] sm:$0xff]  }
  0x12   :  { %951 = vmatprep.subr.bf16.mxu1 %v1036_v17  ;;  %v207_v55 = vcombine.high %v203_v49, %v203_v49  ;;  %672 = vmatprep.mubr.bf16.mxu1 %v206_v52  ;;  %v1069_v3 = vld [vmem:[%s1403_s2 + $0x1e0] sm:$0xff]   ;;  %v1073_v7 = vld [vmem:[%s1403_s2 + $0x1e8] sm:$0xff]   ;;  %v1076_v9 = vld [vmem:[%s1403_s2 + $0x170] sm:$0xff]  }
  0x13   :  { %v1070_v4 = vld [vmem:[%s1403_s2 + $0x120] sm:$0xff]   ;;  %v1074_v8 = vld [vmem:[%s1403_s2 + $0x128] sm:$0xff]  }
  0x14   :  { %930 = vmatpush3.bf16.msra.mxu0 %v1037_v18  ;;  %v1071_v6 = vld [vmem:[%s1403_s2 + $0x1a0] sm:$0xff]  }
  0x15   :  { %952 = vmatpush3.bf16.msra.mxu1 %v1038_v19  ;;  %931 = vmatprep.subr.bf16.mxu0 %v1039_v20  ;;  %v760_v10 = vld [vmem:[%s1401_s0] sm:$0x3] }
  0x16   :  { %953 = vmatprep.subr.bf16.mxu1 %v1040_v21 }
  0x18   :  { %932 = vmatpush3.bf16.msra.mxu0 %v1041_v22 }
  0x19   :  { %954 = vmatpush3.bf16.msra.mxu1 %v1042_v23  ;;  %933 = vmatprep.subr.bf16.mxu0 %v1043_v24 }
  0x1a   :  { %955 = vmatprep.subr.bf16.mxu1 %v1044_v25 }
  0x1c   :  { %934 = vmatpush3.bf16.msra.mxu0 %v1045_v26 }
  0x1d   :  { %956 = vmatpush3.bf16.msra.mxu1 %v1046_v27  ;;  %935 = vmatprep.subr.bf16.mxu0 %v1047_v29 }
  0x1e   :  { %957 = vmatprep.subr.bf16.mxu1 %v1048_v30 }
  0x20   :  { %936 = vmatpush3.bf16.msra.mxu0 %v1049_v31 }
  0x21   :  { %958 = vmatpush3.bf16.msra.mxu1 %v1050_v32  ;;  %965 = vmatprep.subr.bf16.mxu0 %v1052_v35 }
  0x22   :  { %987 = vmatprep.subr.bf16.mxu1 %v1053_v38 }
  0x23   :  { %633 = vmatmul.mubr.bf16.vlgmr.msra.gmra.mrb[0].mxu0 %v182_v45 }
  0x24   :  { %966 = vmatpush3.bf16.msra.mxu0 %v1054_v48  ;;  %673 = vmatmul.mubr.bf16.vlgmr.msra.gmra.mrb[0].mxu1 %v204_v50 }
  0x25   :  { %967 = vmatprep.subr.bf16.mxu0 %v1056_v51  ;;  %988 = vmatpush3.bf16.msra.mxu1 %v1055_v53 }
  0x26   :  { %712 = vmatprep.mubr.bf16.mxu0 %v203_v49  ;;  %989 = vmatprep.subr.bf16.mxu1 %v1057_v54 }
  0x27   :  { %752 = vmatprep.mubr.bf16.mxu1 %v207_v55 }
  0x28   :  { %968 = vmatpush3.bf16.msra.mxu0 %v1058_v56 }
  0x29   :  { %969 = vmatprep.subr.bf16.mxu0 %v1060_v57  ;;  %990 = vmatpush3.bf16.msra.mxu1 %v1059_v58 }
  0x2a   :  { %991 = vmatprep.subr.bf16.mxu1 %v1061_v59 }
  0x2c   :  { %970 = vmatpush3.bf16.msra.mxu0 %v1062_v60 }
  0x2d   :  { %971 = vmatprep.subr.bf16.mxu0 %v1064_v61  ;;  %992 = vmatpush3.bf16.msra.mxu1 %v1063_v62 }
  0x2e   :  { %993 = vmatprep.subr.bf16.mxu1 %v1065_v63 }
  0x30   :  { %972 = vmatpush3.bf16.msra.mxu0 %v1066_v0 }
  0x31   :  { %973 = vmatprep.subr.bf16.mxu0 %v1068_v1  ;;  %994 = vmatpush3.bf16.msra.mxu1 %v1067_v2 }
  0x32   :  { %995 = vmatprep.subr.bf16.mxu1 %v1069_v3 }
  0x34   :  { %974 = vmatpush3.bf16.msra.mxu0 %v1070_v4 }
  0x35   :  { %975 = vmatprep.subr.bf16.mxu0 %v1072_v5 }
  0x36   :  { %10 = vsyncpa [#allocation3], 0  ;;  %996 = vmatpush3.bf16.msra.mxu1 %v1071_v6  ;;  %v1075_v11 = vld [vmem:[%s1403_s2 + $0x1a8] sm:$0xff]   ;;  %v762_v12 = vsel %vm761_vm0, %v760_v10, -inf  ;;  %v1077_v13 = vld [vmem:[%s1403_s2 + $0x1f0] sm:$0xff]   ;;  %v189_v19 = vrot.slane %v1268_v43, %v1264_v41  ;;  %v1125_v59 = vmov 0  }
  0x37   :  { %997 = vmatprep.subr.bf16.mxu1 %v1073_v7  ;;  %763 = vmax.xlane.f32.xlu0 %v762_v12  ;;  %v1078_v14 = vld [vmem:[%s1403_s2 + $0x130] sm:$0xff]   ;;  %v1080_v15 = vld [vmem:[%s1403_s2 + $0x178] sm:$0xff]   ;;  %v855_v30 = vld [vmem:[%s1404_s3] ss:$0 sm:$0xff]  ;;  %s1127_s28 = smov [#allocation2]  }
  0x38   :  { %976 = vmatpush3.bf16.msra.mxu0 %v1074_v8  ;;  %v1079_v16 = vld [vmem:[%s1403_s2 + $0x1b0] sm:$0xff]   ;;  %v1081_v17 = vld [vmem:[%s1403_s2 + $0x1f8] sm:$0xff]   ;;  %v205_v21 = vcombine.high %v189_v19, %v189_v19  ;;  %1017 = vset.pattern.permute.xlu1 %v1125_v59  ;;  %v814_v1 = vld [vmem:[%s1405_s4] sm:$0x3]  ;;  %s847_s29 = sshll.u32 %s1127_s28, 4  ;;  %s848_s29 = int_to_ptr.vmem [resolvable:$true] %s847_s29 }
  0x39   :  { %977 = vmatprep.subr.bf16.mxu0 %v1076_v9  ;;  %v1082_v18 = vld [vmem:[%s1403_s2 + $0x138] sm:$0xff]   ;;  %1018 = vset.pattern.permute.xlu0 %v1125_v59  ;;  %s1100_s6 = scalar_lea.vmem %s848_s29, 128  ;;  %p1105_p1 = scmp.lt.s32.totalorder %s848_s29, %s848_s29 }
  0x3a   :  { %998 = vmatpush3.bf16.msra.mxu1 %v1075_v11  ;;  %v1083_v20 = vld [vmem:[%s1403_s2 + $0x1b8] sm:$0xff]   ;;  %p1101_p0 = scmp.ne.s32.totalorder %s848_s29, %s1100_s6  ;;  %p1106_p2 = scmp.lt.s32.totalorder %s1100_s6, %s1100_s6 }
  0x3b   :  { %999 = vmatprep.subr.bf16.mxu1 %v1077_v13  ;;  %v813_v13 = vand.u32 127, %v163_v28 }
  0x3c   :  { %978 = vmatpush3.bf16.msra.mxu0 %v1078_v14  ;;  %p1107_p3 = por %p1106_p2, %p1105_p1 }
  0x3d   :  { %979 = vmatprep.subr.bf16.mxu0 %v1080_v15 }
  0x3e   :  { %1000 = vmatpush3.bf16.msra.mxu1 %v1079_v16  ;;  %p1108_p4 = pnand %p1107_p3, %p1101_p0 }
  0x3f   :  { %1001 = vmatprep.subr.bf16.mxu1 %v1081_v17 }
  0x40   :  { %980 = vmatpush3.bf16.msra.mxu0 %v1082_v18 }
  0x42   :  { %1002 = vmatpush3.bf16.msra.mxu1 %v1083_v20  ;;  %v1126_v20 = vmov 0.0  }
  0x43   :  { %713 = vmatmul.mubr.bf16.vlgmr.msra.gmra.mrb[4].mxu0 %v189_v19 }
  0x45   :  { %753 = vmatmul.mubr.bf16.vlgmr.msra.gmra.mrb[4].mxu1 %v205_v21 }
  0xc4   :  { %v764_v22 = vpop.xlane.xlu0 %763 }
  0xc5   :  { %v1371_v23 = vsub.f32 %v760_v10, %v764_v22 }
  0xc7   :  { %v766_v24 = vmul.f32 0.05, %v1371_v23  ;;  %v804_v42 = vmul.f32 1.442695, %v1371_v23 }
  0xc9   :  { %v767_v25 = vmul.f32 1.442695, %v766_v24 }
  0xcb   :  { %1084 = vpow2.f32 %v767_v25 }
  0xcc   :  { %1086 = vpow2.f32 %v804_v42 }
  0xd5   :  { %v1085_v26 = vpop.eup %1084 }
  0xd6   :  { %v769_v27 = vsel %vm761_vm0, %v1085_v26, 0.0  ;;  %v1087_v56 = vpop.eup %1086 }
  0xd7   :  { %770 = vadd.xlane.f32.xlu1 %v769_v27  ;;  %v806_v58 = vsel %vm761_vm0, %v1087_v56, 0.0 }
  0xf6   :  { %v937_v29 = vpop.f32.mrb[0].mxu0 }
  0xf7   :  { %v938_v31 = vpop.f32.mrb[1].mxu0  ;;  %v959_v32 = vpop.f32.mrb[0].mxu1 }
  0xf8   :  { %v939_v33 = vadd.f32 %v938_v31, %v937_v29  ;;  %v940_v34 = vpop.f32.mrb[2].mxu0  ;;  %v960_v35 = vpop.f32.mrb[1].mxu1 }
  0xf9   :  { %v941_v36 = vpop.f32.mrb[3].mxu0  ;;  %v961_v38 = vadd.f32 %v960_v35, %v959_v32  ;;  %v962_v39 = vpop.f32.mrb[2].mxu1 }
  0xfa   :  { %v635_v37 = vadd.f32 %v939_v33, %v855_v30  ;;  %v963_v40 = vpop.f32.mrb[3].mxu1 }
  0xfc   :  { %v675_v41 = vadd.f32 %v961_v38, %v635_v37 }
 0x116   :  { %v981_v43 = vpop.f32.mrb[4].mxu0 }
 0x117   :  { %v982_v44 = vpop.f32.mrb[5].mxu0 }
 0x118   :  { %v1003_v45 = vpop.f32.mrb[4].mxu1  ;;  %v983_v46 = vadd.f32 %v982_v44, %v981_v43  ;;  %v984_v47 = vpop.f32.mrb[6].mxu0 }
 0x119   :  { %v1004_v48 = vpop.f32.mrb[5].mxu1  ;;  %v985_v49 = vpop.f32.mrb[7].mxu0 }
 0x11a   :  { %v715_v50 = vadd.f32 %v983_v46, %v675_v41  ;;  %v1005_v51 = vadd.f32 %v1004_v48, %v1003_v45  ;;  %v1006_v52 = vpop.f32.mrb[6].mxu1 }
 0x11b   :  { %v1007_v53 = vpop.f32.mrb[7].mxu1 }
 0x11c   :  { %v755_v54 = vadd.f32 %v1005_v51, %v715_v50 }
 0x11e   :  { %v777_v55 = vmul.f32 0.05, %v755_v54 }
 0x120   :  { %v778_v57 = vsel %vm761_vm0, %v777_v55, -inf }
 0x121   :  { %779 = vmax.xlane.f32.xlu0 %v778_v57 }
 0x125   :  { %807 = vadd.xlane.f32.xlu0 %v806_v58 }
 0x164   :  { %v771_v2 = vpop.xlane.xlu1 %770 }
 0x1ae   :  { %v780_v60 = vpop.xlane.xlu0 %779 }
 0x1af   :  { %v781_v61 = vsub.f32 %v777_v55, %v780_v60 }
 0x1b1   :  { %v782_v62 = vmul.f32 1.442695, %v781_v61 }
 0x1b2   :  { %v808_v7 = vpop.xlane.xlu0 %807 }
 0x1b3   :  { %1088 = vpow2.f32 %v782_v62 }
 0x1b4   :  { %1090 = vlog2.f32 %v771_v2 }
 0x1bd   :  { %v1089_v63 = vpop.eup %1088 }
 0x1be   :  { %v784_v0 = vsel %vm761_vm0, %v1089_v63, 0.0  ;;  %v1091_v4 = vpop.eup %1090 }
 0x1bf   :  { %785 = vadd.xlane.f32.xlu1 %v784_v0  ;;  %v773_v5 = vmul.f32 0.6931472, %v1091_v4 }
 0x1c1   :  { %v774_v6 = vsub.f32 %v766_v24, %v773_v5 }
 0x1c3   :  { %v775_v9 = vmul.f32 1.442695, %v774_v6 }
 0x1d0   :  { %816 = vperm.xlu1 %1017, %v814_v1  }
 0x24c   :  { %v786_v3 = vpop.xlane.xlu1 %785 }
 0x24d   :  { %1092 = vlog2.f32 %v786_v3 }
 0x24e   :  { %1094 = vlog2.f32 %v808_v7 }
 0x24f   :  { %1096 = vpow2.f32 %v775_v9 }
 0x250   :  { %v817_v15 = vpop.permute.xlu1 %816 }
 0x251   :  { %vm818_vm1 = vcmp.eq.s32.totalorder %v813_v13, %v817_v15 }
 0x252   :  { %v920_v21 = vsel %vm818_vm1, 1.0, %v1126_v20 }
 0x257   :  { %v1093_v8 = vpop.eup %1092 }
 0x258   :  { %v788_v10 = vmul.f32 0.6931472, %v1093_v8  ;;  %v1095_v14 = vpop.eup %1094 }
 0x259   :  { %v810_v16 = vmul.f32 0.6931472, %v1095_v14  ;;  %v1097_v17 = vpop.eup %1096 }
 0x25a   :  { %v789_v11 = vsub.f32 %v781_v61, %v788_v10 }
 0x25b   :  { %v811_v24 = vsub.f32 %v1371_v23, %v810_v16 }
 0x25c   :  { %v790_v12 = vmul.f32 1.442695, %v789_v11  ;;  %v792_v18 = vsub.f32 %v789_v11, %v1097_v17 }
 0x25d   :  { %v821_v26 = vmul.f32 %v920_v21, %v811_v24 }
 0x25e   :  { %1098 = vpow2.f32 %v790_v12 }
 0x25f   :  { %v822_v27 = vsel %vm761_vm0, %v821_v26, 0.0 }
 0x268   :  { %v1099_v19 = vpop.eup %1098 }
 0x269   :  { %v793_v22 = vmul.f32 %v1099_v19, %v792_v18 }
 0x26b   :  { %v794_v25 = vsel %vm761_vm0, %v793_v22, 0.0 }
 0x26c   :  { %795 = vadd.xlane.f32.xlu0 %v794_v25 }
 0x270   :  { %823 = vadd.xlane.f32.xlu0 %v822_v27 }
 0x2f9   :  { %v796_v28 = vpop.xlane.xlu0 %795 }
 0x2fa   :  { %v797_v29 = vrot.slane %v796_v28, 4 }
 0x2fc   :  { %v798_v30 = vadd.f32 %v797_v29, %v796_v28 }
 0x2fd   :  { %v824_v31 = vpop.xlane.xlu0 %823 }
 0x2fe   :  { %v799_v32 = vrot.slane %v798_v30, 2  ;;  %v825_v33 = vrot.slane %v824_v31, 4 }
 0x300   :  { %v826_v34 = vadd.f32 %v825_v33, %v824_v31  ;;  %v800_v35 = vadd.f32 %v799_v32, %v798_v30 }
 0x302   :  { %v827_v36 = vrot.slane %v826_v34, 2  ;;  %v801_v37 = vrot.slane %v800_v35, 1 }
 0x304   :  { %v828_v38 = vadd.f32 %v827_v36, %v826_v34  ;;  %v802_v39 = vadd.f32 %v801_v37, %v800_v35 }
 0x306   :  { %1009 = vpush %v802_v39  ;;  %v829_v23 = vrot.slane %v828_v38, 1 }
 0x308   :  { %v830_v40 = vadd.f32 %v829_v23, %v828_v38 }
 0x30a   :  { %1011 = vpush %v830_v40 }
 0x337   :  { %s1010_s4 = spop %1009 }
 0x338   :  { %s833_s25 = smul.f32 0.1, %s1010_s4 }
 0x33b   :  { %s1012_s23 = spop %1011 }
 0x33c   :  { %s832_s24 = ssub.f32 0.0, %s1012_s23 }
 0x33e   :  { %s834_s26 = smul.f32 0.9, %s832_s24 }
 0x340   :  { %s835_s27 = sadd.f32 %s834_s26, %s833_s25 }
 0x342   :  { %s838_s30 = smul.f32 0.5, %s835_s27 }
 0x344   :  { %v839_v41 = vstv %s838_s30 }
 0x345   :  { %840 = vst [vmem:[#allocation2] sm:$0xff] %v839_v41 }
 0x346   :  { %1111 = shalt.err (!%p1108_p4)
}
 0x347   :  { %s1112_s9 = scalar_lea.hbm %s1406_s5, 128 }
 0x348   :  { %p1113_p5 = scmp.ne.s32.totalorder %s1406_s5, %s1112_s9  ;;  %p1116_p6 = scmp.lt.u32.totalorder %s1112_s9, %s1406_s5 }
 0x34a   :  { %p1118_p7 = pnand %p1116_p6, %p1113_p5 }
 0x34c   :  { %1121 = shalt.err (!%p1118_p7)
}
 0x34d   :  { %850 = dma.vmem_to_hbm [thread:$0]  %s848_s29, 128, %s1406_s5, [#allocation3]  }
 0x34e   :  { %1122 = dma.done.wait [#allocation3], 128  }
 0x34f   :  { %1123 = vsyncadd [#allocation3], 4294967168 }
 0x350   :  { %854 = vsyncpa [#allocation3], 1 }

</bundles_post_ra>
